<compile_context>
chip_gen: v6e
topology: v6e:2x2x1
jax: 0.10.0
libtpu: 0.0.40
codegen_flags: <defaults>
</compile_context>

<pallas_src>
import functools

import numpy as np
import jax
import jax.numpy as jnp
from jax.experimental import pallas as pl
from jax.experimental.pallas import tpu as pltpu

# ----- cfg (constants from the original config) ------------------------------
RPN_POSITIVE_OVERLAP = 0.7
RPN_NEGATIVE_OVERLAP = 0.3
RPN_FG_FRACTION = 0.5
RPN_BATCHSIZE = 256
ANCHOR_SCALES = (2.0, 3.0, 4.0)
ANCHOR_RATIOS = (0.5, 1.0, 2.0)

_PAD = -1.0e6  # padding value for anchors / gt boxes (forces "outside", IoU=0)


def _round_up(x, m):
    return ((x + m - 1) // m) * m


# ----- shared per-tile geometry (bit-identical across both passes) -----------
def _tile_overlaps(im_ref, anc_ref, gt_ref, border):
    """anchors (4, TILE) coord-major, gt (GP, 4) row-major -> IoU (GP, TILE)."""
    anc = anc_ref[...]                                   # (4, TILE)
    ax1 = anc[0:1, :]
    ay1 = anc[1:2, :]
    ax2 = anc[2:3, :]
    ay2 = anc[3:4, :]

    gt = gt_ref[...]                                     # (GP, 4)
    gx1 = gt[:, 0:1]
    gy1 = gt[:, 1:2]
    gx2 = gt[:, 2:3]
    gy2 = gt[:, 3:4]

    # int(im_info[...]) truncation was done in the wrapper (int32); back to f32.
    im_h = im_ref[0].astype(jnp.float32)
    im_w = im_ref[1].astype(jnp.float32)

    # inside-image mask (replaces nonzero(keep))
    inside = ((ax1 >= -border) & (ay1 >= -border)
              & (ax2 < im_w + border) & (ay2 < im_h + border))     # (1, TILE)

    # bbox_overlaps (IoU, +1 pixel convention)
    aw = ax2 - ax1 + 1.0
    ah = ay2 - ay1 + 1.0
    a_area = aw * ah                                     # (1, TILE)
    gw = gx2 - gx1 + 1.0
    gh = gy2 - gy1 + 1.0
    g_area = gw * gh                                     # (GP, 1)

    iw = jnp.maximum(jnp.minimum(ax2, gx2) - jnp.maximum(ax1, gx1) + 1.0, 0.0)
    ih = jnp.maximum(jnp.minimum(ay2, gy2) - jnp.maximum(ay1, gy1) + 1.0, 0.0)
    inter = iw * ih                                      # (GP, TILE)
    # EUP approx reciprocal; denominator >= max(a_area, g_area) >= 1, and the
    # 0.3 / 0.7 thresholds easily tolerate ~2^-12 relative error.
    overlaps = inter * pl.reciprocal(a_area + g_area - inter, approx=True)

    max_ov = jnp.max(overlaps, axis=0, keepdims=True)    # (1, TILE)
    return inside, overlaps, max_ov, (ax1, ay1, aw, ah), (gx1, gy1, gx2, gy2)


def _presample_labels(inside, overlaps, max_ov, gt_max_raw):
    """Pre-subsample labels, exactly in the order of the provided module."""
    gt_max = jnp.where(gt_max_raw == 0.0, 1e-5, gt_max_raw)         # (GP, 1)
    matched = jnp.max(jnp.where(overlaps == gt_max, 1.0, 0.0),
                      axis=0, keepdims=True) > 0.0                  # (1, TILE)

    labels = jnp.full(max_ov.shape, -1.0, jnp.float32)
    labels = jnp.where(inside & matched, 1.0, labels)
    labels = jnp.where(inside & (max_ov >= RPN_POSITIVE_OVERLAP), 1.0, labels)
    # NOTE(review): the canonical anchor_target_layer (RPN_CLOBBER_POSITIVES=False)
    # applies the negative rule BEFORE the gt-argmax positives; the provided
    # PyTorch module applies it LAST.  We reproduce the provided module exactly.
    labels = jnp.where(inside & (max_ov < RPN_NEGATIVE_OVERLAP), 0.0, labels)
    return labels


def _lane_inclusive_prefix(x):
    """Inclusive prefix sum along the lane axis (Hillis-Steele roll/add scan)."""
    lane = jax.lax.broadcasted_iota(jnp.int32, x.shape, 1)
    k = 1
    L = x.shape[1]
    while k < L:
        rolled = pltpu.roll(x, k, axis=1)
        x = x + jnp.where(lane >= k, rolled, 0.0)
        k *= 2
    return x


# ----- pass A: per-gt max over inside anchors + total pre-cap fg count --------
def _stats_kernel(im_ref, anc_ref, gt_ref, gtmax_ref, fgcnt_ref, *, border):
    phase = pl.program_id(0)
    tile = pl.program_id(1)

    inside, overlaps, max_ov, _, _ = _tile_overlaps(im_ref, anc_ref, gt_ref, border)

    @pl.when(phase == 0)
    def _gt_max_pass():
        @pl.when(tile == 0)
        def _():
            gtmax_ref[...] = jnp.zeros_like(gtmax_ref)
        ov_in = jnp.where(inside, overlaps, 0.0)                    # inside only
        gtmax_ref[...] = jnp.maximum(gtmax_ref[...],
                                     jnp.max(ov_in, axis=1, keepdims=True))

    @pl.when(phase == 1)
    def _fg_count_pass():
        @pl.when(tile == 0)
        def _():
            fgcnt_ref[...] = jnp.zeros_like(fgcnt_ref)
        labels = _presample_labels(inside, overlaps, max_ov, gtmax_ref[...])
        fg = jnp.where(labels == 1.0, 1.0, 0.0)
        fgcnt_ref[...] = fgcnt_ref[...] + jnp.sum(fg, axis=1, keepdims=True)


# ----- pass B: labels, subsampling, bbox targets & weights --------------------
def _emit_kernel(im_ref, anc_ref, gt_ref, gtmax_ref, fgcnt_ref,
                 lbl_ref, tgt_ref, biw_ref, bow_ref,
                 runfg_ref, runbg_ref, *, border):
    tile = pl.program_id(0)

    @pl.when(tile == 0)
    def _():
        runfg_ref[...] = jnp.zeros_like(runfg_ref)
        runbg_ref[...] = jnp.zeros_like(runbg_ref)

    (inside, overlaps, max_ov,
     (ax1, ay1, aw, ah),
     (gx1, gy1, gx2, gy2)) = _tile_overlaps(im_ref, anc_ref, gt_ref, border)

    labels = _presample_labels(inside, overlaps, max_ov, gtmax_ref[...])
    fg = jnp.where(labels == 1.0, 1.0, 0.0)              # pre-subsample indicators
    bg = jnp.where(labels == 0.0, 1.0, 0.0)

    # fused fg/bg inclusive prefix along lanes (within-tile ranks)
    cum = _lane_inclusive_prefix(jnp.concatenate([fg, bg], axis=0))  # (2, TILE)
    cum_fg = cum[0:1, :]
    cum_bg = cum[1:2, :]

    num_fg = float(int(RPN_FG_FRACTION * RPN_BATCHSIZE))
    sum_fg = fgcnt_ref[...]                               # (1,1) total pre-cap fg
    num_bg = float(RPN_BATCHSIZE) - jnp.minimum(sum_fg, num_fg)      # (1,1)

    rank_fg = runfg_ref[...] + cum_fg                     # global inclusive rank
    rank_bg = runbg_ref[...] + cum_bg

    # TODO(synk): the reference disables a *random* subset of excess fg/bg anchors
    # (np.random.permutation); this cap deterministically keeps the lowest indices.
    labels = jnp.where((fg > 0.0) & (rank_fg > num_fg), -1.0, labels)
    labels = jnp.where((bg > 0.0) & (rank_bg > num_bg), -1.0, labels)

    runfg_ref[...] = runfg_ref[...] + jnp.sum(fg, axis=1, keepdims=True)
    runbg_ref[...] = runbg_ref[...] + jnp.sum(bg, axis=1, keepdims=True)

    # ---- bbox_transform(anchors, gt[argmax_overlaps]) via unrolled select-gather
    GP = overlaps.shape[0]
    tgx1 = jnp.zeros_like(max_ov)
    tgy1 = jnp.zeros_like(max_ov)
    tgx2 = jnp.zeros_like(max_ov)
    tgy2 = jnp.zeros_like(max_ov)
    for g in reversed(range(GP)):                         # reversed -> first max wins
        sel = overlaps[g:g + 1, :] == max_ov
        tgx1 = jnp.where(sel, gx1[g:g + 1, :], tgx1)
        tgy1 = jnp.where(sel, gy1[g:g + 1, :], tgy1)
        tgx2 = jnp.where(sel, gx2[g:g + 1, :], tgx2)
        tgy2 = jnp.where(sel, gy2[g:g + 1, :], tgy2)

    inv_aw = 1.0 / aw
    inv_ah = 1.0 / ah
    ex_cx = ax1 + 0.5 * aw
    ex_cy = ay1 + 0.5 * ah
    g_w = tgx2 - tgx1 + 1.0
    g_h = tgy2 - tgy1 + 1.0
    g_cx = tgx1 + 0.5 * g_w
    g_cy = tgy1 + 0.5 * g_h

    dx = (g_cx - ex_cx) * inv_aw
    dy = (g_cy - ex_cy) * inv_ah
    dw = jnp.log(g_w * inv_aw)
    dh = jnp.log(g_h * inv_ah)
    tgt = jnp.concatenate([dx, dy, dw, dh], axis=0)       # (4, TILE) coord-major

    pos = labels == 1.0
    neg = labels == 0.0
    w = 1.0 / float(RPN_BATCHSIZE)

    lbl_ref[...] = labels                                 # _unmap fill = -1 applied
    tgt_ref[...] = jnp.where(inside, tgt, 0.0)            # _unmap fill = 0
    biw_ref[...] = jnp.broadcast_to(jnp.where(pos, 1.0, 0.0), tgt.shape)
    bow_ref[...] = jnp.broadcast_to(jnp.where(pos | neg, w, 0.0), tgt.shape)


# ----- wrapper ----------------------------------------------------------------
def anchor_target_forward(rpn_cls_score, gt_boxes, im_info, anchors,
                          allowed_border=0, tile_lanes=2048):
    H, W = int(rpn_cls_score.shape[2]), int(rpn_cls_score.shape[3])
    A = len(ANCHOR_SCALES) * len(ANCHOR_RATIOS)
    N = int(anchors.shape[0])
    assert N == H * W * A, "anchors must be (H*W*A, 4)"

    gt = jnp.asarray(gt_boxes[0, :, :4], jnp.float32)     # (G, 4)
    G = int(gt.shape[0])
    GP = max(8, _round_up(G, 8))

    tile = _round_up(min(int(tile_lanes), _round_up(N, 128)), 128)
    Np = _round_up(N, tile)
    T = Np // tile
    border = float(allowed_border)

    # coordinate-major, lane-dense layouts
    anc_cm = jnp.full((Np, 4), _PAD, jnp.float32).at[:N].set(
        jnp.asarray(anchors, jnp.float32)).T              # (4, Np)
    gt_rows = jnp.full((GP, 4), _PAD, jnp.float32).at[:G].set(gt)  # (GP, 4)
    # int() truncation of im_info, as in the reference; [height, width]
    im = jnp.asarray(im_info, jnp.float32).reshape(-1)[:2].astype(jnp.int32)

    # ---- pass A ----
    cost_a = pl.CostEstimate(
        flops=int(2 * Np * GP * 16),
        transcendentals=int(2 * Np * GP),
        bytes_accessed=int((2 * 4 * Np + 2 * 4 * GP + GP + 1) * 4))
    gt_max, fg_total = pl.pallas_call(
        functools.partial(_stats_kernel, border=border),
        out_shape=(jax.ShapeDtypeStruct((GP, 1), jnp.float32),
                   jax.ShapeDtypeStruct((1, 1), jnp.float32)),
        grid_spec=pltpu.PrefetchScalarGridSpec(
            num_scalar_prefetch=1,
            grid=(2, T),
            in_specs=[pl.BlockSpec((4, tile), lambda p, t, im_s: (0, t)),
                      pl.BlockSpec((GP, 4), lambda p, t, im_s: (0, 0))],
            out_specs=(pl.BlockSpec((GP, 1), lambda p, t, im_s: (0, 0)),
                       pl.BlockSpec((1, 1), lambda p, t, im_s: (0, 0)))),
        compiler_params=pltpu.CompilerParams(
            dimension_semantics=("arbitrary", "arbitrary"),
            vmem_limit_bytes=32 * 1024 * 1024),
        cost_estimate=cost_a,
    )(im, anc_cm, gt_rows)

    # ---- pass B ----
    cost_b = pl.CostEstimate(
        flops=int(Np * (GP * 24 + 80)),
        transcendentals=int(Np * (GP + 2)),
        bytes_accessed=int((4 * Np + 13 * Np + 4 * GP + GP + 1) * 4))
    lbl, tgt, biw, bow = pl.pallas_call(
        functools.partial(_emit_kernel, border=border),
        out_shape=(jax.ShapeDtypeStruct((1, Np), jnp.float32),   # labels
                   jax.ShapeDtypeStruct((4, Np), jnp.float32),   # bbox_target
                   jax.ShapeDtypeStruct((4, Np), jnp.float32),   # inside weights
                   jax.ShapeDtypeStruct((4, Np), jnp.float32)),  # outside weights
        grid_spec=pltpu.PrefetchScalarGridSpec(
            num_scalar_prefetch=1,
            grid=(T,),
            in_specs=[pl.BlockSpec((4, tile), lambda t, im_s: (0, t)),
                      pl.BlockSpec((GP, 4), lambda t, im_s: (0, 0)),
                      pl.BlockSpec((GP, 1), lambda t, im_s: (0, 0)),
                      pl.BlockSpec((1, 1), lambda t, im_s: (0, 0))],
            out_specs=(pl.BlockSpec((1, tile), lambda t, im_s: (0, t)),
                       pl.BlockSpec((4, tile), lambda t, im_s: (0, t)),
                       pl.BlockSpec((4, tile), lambda t, im_s: (0, t)),
                       pl.BlockSpec((4, tile), lambda t, im_s: (0, t))),
            scratch_shapes=[pltpu.VMEM((1, 1), jnp.float32),     # running fg count
                            pltpu.VMEM((1, 1), jnp.float32)]),   # running bg count
        compiler_params=pltpu.CompilerParams(
            # carried running counters make the tile axis inherently sequential
            dimension_semantics=("arbitrary",),
            vmem_limit_bytes=32 * 1024 * 1024),
        cost_estimate=cost_b,
    )(im, anc_cm, gt_rows, gt_max, fg_total)

    # ----- final reshapes (glue, identical to the PyTorch view/permute) -------
    labels = lbl[0, :N].reshape(1, H, W, A).transpose(0, 3, 1, 2)
    labels = labels.reshape(1, 1, A * H, W)

    def _to_nchw(x_cm):
        return x_cm[:, :N].T.reshape(1, H, W, A * 4).transpose(0, 3, 1, 2)

    return [labels, _to_nchw(tgt), _to_nchw(biw), _to_nchw(bow)]


# ----- deterministic anchor generation (synthetic "parameters") --------------
def _generate_base_anchors(base_size, ratios, scales):
    x_ctr = y_ctr = 0.5 * (base_size - 1)
    size = float(base_size) * float(base_size)
    out = []
    for r in ratios:
        ws = np.round(np.sqrt(size / r))
        hs = np.round(ws * r)
        for s in scales:
            w = ws * s
            h = hs * s
            out.append([x_ctr - 0.5 * (w - 1), y_ctr - 0.5 * (h - 1),
                        x_ctr + 0.5 * (w - 1), y_ctr + 0.5 * (h - 1)])
    return np.array(out, dtype=np.float32)


def generate_all_anchors(H, W, stride):
    base = _generate_base_anchors(stride, ANCHOR_RATIOS, ANCHOR_SCALES)  # (A,4)
    sx, sy = np.meshgrid(np.arange(W) * stride, np.arange(H) * stride)   # (H,W)
    shifts = np.stack([sx.ravel(), sy.ravel(), sx.ravel(), sy.ravel()],
                      axis=1).astype(np.float32)                         # (H*W,4)
    all_anchors = (base[None, :, :] + shifts[:, None, :]).reshape(-1, 4)
    return all_anchors.astype(np.float32)


# ----- demo -------------------------------------------------------------------
if __name__ == "__main__":
    H, W = 8, 8
    A = len(ANCHOR_SCALES) * len(ANCHOR_RATIOS)          # 9
    feat_stride = 4
    im_h, im_w = 32.0, 32.0

    anchors = generate_all_anchors(H, W, feat_stride)    # (576, 4) numpy

    key = jax.random.PRNGKey(0)
    k1, k2, k3 = jax.random.split(key, 3)

    rpn_cls_score = jax.random.normal(k1, (1, 2 * A, H, W), jnp.float32)

    G = 3
    cxy = jax.random.uniform(k2, (G, 2), minval=6.0, maxval=26.0)
    wh = jax.random.uniform(k3, (G, 2), minval=4.0, maxval=14.0)
    x1y1 = jnp.clip(cxy - wh / 2.0, 0.0, im_w - 2.0)
    x2y2 = jnp.clip(cxy + wh / 2.0, x1y1 + 1.0, im_w - 1.0)
    gt_boxes = jnp.concatenate([x1y1, x2y2, jnp.ones((G, 1))], axis=1)[None]  # (1,G,5)
    im_info = jnp.array([[im_h, im_w, 1.0]], jnp.float32)

    # tile_lanes=256 -> 3 anchor tiles, exercising the carried-counter multi-tile path
    outs = anchor_target_forward(rpn_cls_score, gt_boxes, im_info, anchors,
                                 allowed_border=0, tile_lanes=256)
    jax.block_until_ready(outs)

    assert outs[0].shape == (1, 1, A * H, W)
    assert outs[1].shape == (1, A * 4, H, W)
    assert outs[2].shape == (1, A * 4, H, W)
    assert outs[3].shape == (1, A * 4, H, W)

    lab = np.asarray(outs[0]).ravel()
    assert np.all(np.isin(lab, [-1.0, 0.0, 1.0])), "labels outside {-1,0,1}"
    assert int((lab == 1.0).sum()) <= int(RPN_FG_FRACTION * RPN_BATCHSIZE)
    assert int((lab >= 0.0).sum()) <= RPN_BATCHSIZE
    for o in outs:
        assert bool(np.isfinite(np.asarray(o)).all())
    print("KERNEL_OK")
</pallas_src>

<mosaic_0001>
module attributes {stable_mosaic.version = 11 : i64} {
  func.func @_stats_kernel(%arg0: i32, %arg1: i32, %arg2: memref<2xi32, #tpu.memory_space<smem>>, %arg3: memref<4x256xf32, #tpu.memory_space<vmem>>, %arg4: memref<8x4xf32, #tpu.memory_space<vmem>>, %arg5: memref<8x1xf32, #tpu.memory_space<vmem>>, %arg6: memref<1x1xf32, #tpu.memory_space<vmem>>) attributes {dimension_semantics = [#tpu.dimension_semantics<arbitrary>, #tpu.dimension_semantics<arbitrary>], iteration_bounds = array<i64: 2, 3>, scalar_prefetch = 1 : i64, scratch_operands = 0 : i64, tpu.core_type = #tpu.core_type<tc>, window_params = [{transform_indices = @transform_0, window_bounds = array<i64: 4, 256>}, {pipeline_mode = #tpu.pipeline_mode<synchronous>, transform_indices = @transform_1, window_bounds = array<i64: 8, 4>}, {pipeline_mode = #tpu.pipeline_mode<synchronous>, transform_indices = @transform_2, window_bounds = array<i64: 8, 1>}, {pipeline_mode = #tpu.pipeline_mode<synchronous>, transform_indices = @transform_3, window_bounds = array<i64: 1, 1>}]} {
    %c0 = arith.constant 0 : index
    %c0_0 = arith.constant 0 : index
    %0 = vector.load %arg3[%c0, %c0_0] : memref<4x256xf32, #tpu.memory_space<vmem>>, vector<4x256xf32>
    %1 = vector.extract_strided_slice %0 {offsets = [0, 0], sizes = [1, 256], strides = [1, 1]} : vector<4x256xf32> to vector<1x256xf32>
    %2 = vector.extract_strided_slice %0 {offsets = [1, 0], sizes = [1, 256], strides = [1, 1]} : vector<4x256xf32> to vector<1x256xf32>
    %3 = vector.extract_strided_slice %0 {offsets = [2, 0], sizes = [1, 256], strides = [1, 1]} : vector<4x256xf32> to vector<1x256xf32>
    %4 = vector.extract_strided_slice %0 {offsets = [3, 0], sizes = [1, 256], strides = [1, 1]} : vector<4x256xf32> to vector<1x256xf32>
    %c0_1 = arith.constant 0 : index
    %c0_2 = arith.constant 0 : index
    %5 = vector.load %arg4[%c0_1, %c0_2] : memref<8x4xf32, #tpu.memory_space<vmem>>, vector<8x4xf32>
    %6 = vector.extract_strided_slice %5 {offsets = [0, 0], sizes = [8, 1], strides = [1, 1]} : vector<8x4xf32> to vector<8x1xf32>
    %7 = vector.extract_strided_slice %5 {offsets = [0, 1], sizes = [8, 1], strides = [1, 1]} : vector<8x4xf32> to vector<8x1xf32>
    %8 = vector.extract_strided_slice %5 {offsets = [0, 2], sizes = [8, 1], strides = [1, 1]} : vector<8x4xf32> to vector<8x1xf32>
    %9 = vector.extract_strided_slice %5 {offsets = [0, 3], sizes = [8, 1], strides = [1, 1]} : vector<8x4xf32> to vector<8x1xf32>
    %c0_3 = arith.constant 0 : index
    %10 = memref.load %arg2[%c0_3] : memref<2xi32, #tpu.memory_space<smem>>
    %11 = arith.sitofp %10 : i32 to f32
    %c1 = arith.constant 1 : index
    %12 = memref.load %arg2[%c1] : memref<2xi32, #tpu.memory_space<smem>>
    %13 = arith.sitofp %12 : i32 to f32
    %cst = arith.constant -0.000000e+00 : f32
    %14 = vector.broadcast %cst : f32 to vector<1x256xf32>
    %15 = arith.cmpf oge, %1, %14 : vector<1x256xf32>
    %cst_4 = arith.constant -0.000000e+00 : f32
    %16 = vector.broadcast %cst_4 : f32 to vector<1x256xf32>
    %17 = arith.cmpf oge, %2, %16 : vector<1x256xf32>
    %18 = arith.andi %15, %17 : vector<1x256xi1>
    %cst_5 = arith.constant 0.000000e+00 : f32
    %19 = arith.addf %13, %cst_5 : f32
    %20 = vector.broadcast %19 : f32 to vector<1x256xf32>
    %21 = arith.cmpf olt, %3, %20 : vector<1x256xf32>
    %22 = arith.andi %18, %21 : vector<1x256xi1>
    %cst_6 = arith.constant 0.000000e+00 : f32
    %23 = arith.addf %11, %cst_6 : f32
    %24 = vector.broadcast %23 : f32 to vector<1x256xf32>
    %25 = arith.cmpf olt, %4, %24 : vector<1x256xf32>
    %26 = arith.andi %22, %25 : vector<1x256xi1>
    %27 = arith.subf %3, %1 : vector<1x256xf32>
    %cst_7 = arith.constant 1.000000e+00 : f32
    %28 = vector.broadcast %cst_7 : f32 to vector<1x256xf32>
    %29 = arith.addf %27, %28 : vector<1x256xf32>
    %30 = arith.subf %4, %2 : vector<1x256xf32>
    %cst_8 = arith.constant 1.000000e+00 : f32
    %31 = vector.broadcast %cst_8 : f32 to vector<1x256xf32>
    %32 = arith.addf %30, %31 : vector<1x256xf32>
    %33 = arith.mulf %29, %32 : vector<1x256xf32>
    %34 = arith.subf %8, %6 : vector<8x1xf32>
    %cst_9 = arith.constant 1.000000e+00 : f32
    %35 = vector.broadcast %cst_9 : f32 to vector<8x1xf32>
    %36 = arith.addf %34, %35 : vector<8x1xf32>
    %37 = arith.subf %9, %7 : vector<8x1xf32>
    %cst_10 = arith.constant 1.000000e+00 : f32
    %38 = vector.broadcast %cst_10 : f32 to vector<8x1xf32>
    %39 = arith.addf %37, %38 : vector<8x1xf32>
    %40 = arith.mulf %36, %39 : vector<8x1xf32>
    %41 = vector.broadcast %3 : vector<1x256xf32> to vector<8x256xf32>
    %42 = vector.broadcast %8 : vector<8x1xf32> to vector<8x256xf32>
    %43 = arith.minimumf %41, %42 : vector<8x256xf32>
    %44 = vector.broadcast %1 : vector<1x256xf32> to vector<8x256xf32>
    %45 = vector.broadcast %6 : vector<8x1xf32> to vector<8x256xf32>
    %46 = arith.maximumf %44, %45 : vector<8x256xf32>
    %47 = arith.subf %43, %46 : vector<8x256xf32>
    %cst_11 = arith.constant 1.000000e+00 : f32
    %48 = vector.broadcast %cst_11 : f32 to vector<8x256xf32>
    %49 = arith.addf %47, %48 : vector<8x256xf32>
    %cst_12 = arith.constant 0.000000e+00 : f32
    %50 = vector.broadcast %cst_12 : f32 to vector<8x256xf32>
    %51 = arith.maximumf %49, %50 : vector<8x256xf32>
    %52 = vector.broadcast %4 : vector<1x256xf32> to vector<8x256xf32>
    %53 = vector.broadcast %9 : vector<8x1xf32> to vector<8x256xf32>
    %54 = arith.minimumf %52, %53 : vector<8x256xf32>
    %55 = vector.broadcast %2 : vector<1x256xf32> to vector<8x256xf32>
    %56 = vector.broadcast %7 : vector<8x1xf32> to vector<8x256xf32>
    %57 = arith.maximumf %55, %56 : vector<8x256xf32>
    %58 = arith.subf %54, %57 : vector<8x256xf32>
    %cst_13 = arith.constant 1.000000e+00 : f32
    %59 = vector.broadcast %cst_13 : f32 to vector<8x256xf32>
    %60 = arith.addf %58, %59 : vector<8x256xf32>
    %cst_14 = arith.constant 0.000000e+00 : f32
    %61 = vector.broadcast %cst_14 : f32 to vector<8x256xf32>
    %62 = arith.maximumf %60, %61 : vector<8x256xf32>
    %63 = arith.mulf %51, %62 : vector<8x256xf32>
    %64 = vector.broadcast %33 : vector<1x256xf32> to vector<8x256xf32>
    %65 = vector.broadcast %40 : vector<8x1xf32> to vector<8x256xf32>
    %66 = arith.addf %64, %65 : vector<8x256xf32>
    %67 = arith.subf %66, %63 : vector<8x256xf32>
    %68 = tpu.reciprocal %67 {approx = true} : vector<8x256xf32> -> vector<8x256xf32>
    %69 = arith.mulf %63, %68 : vector<8x256xf32>
    %cst_15 = arith.constant dense<0xFF800000> : vector<256xf32>
    %70 = vector.multi_reduction <maximumf>, %69, %cst_15 [0] : vector<8x256xf32> to vector<256xf32>
    %71 = vector.shape_cast %70 : vector<256xf32> to vector<1x256xf32>
    %c0_i32 = arith.constant 0 : i32
    %72 = arith.cmpi eq, %arg0, %c0_i32 : i32
    %73 = arith.extui %72 : i1 to i32
    %c0_i32_16 = arith.constant 0 : i32
    %74 = arith.cmpi ne, %73, %c0_i32_16 : i32
    scf.if %74 {
      %c0_i32_18 = arith.constant 0 : i32
      %78 = arith.cmpi eq, %arg1, %c0_i32_18 : i32
      %79 = arith.extui %78 : i1 to i32
      %c0_i32_19 = arith.constant 0 : i32
      %80 = arith.cmpi ne, %79, %c0_i32_19 : i32
      scf.if %80 {
        %cst_26 = arith.constant 0.000000e+00 : f32
        %90 = vector.broadcast %cst_26 : f32 to vector<8x1xf32>
        %c0_27 = arith.constant 0 : index
        %c0_28 = arith.constant 0 : index
        %91 = vector.load %arg5[%c0_27, %c0_28] : memref<8x1xf32, #tpu.memory_space<vmem>>, vector<8x1xf32>
        tpu.vector_store %arg5[%c0_27, %c0_28], %90 {strides = array<i32>} : memref<8x1xf32, #tpu.memory_space<vmem>>, vector<8x1xf32>,
      } else {
      }
      %cst_20 = arith.constant 0.000000e+00 : f32
      %81 = vector.shape_cast %26 : vector<1x256xi1> to vector<1x256xi1>
      %82 = vector.broadcast %81 : vector<1x256xi1> to vector<8x256xi1>
      %83 = vector.broadcast %cst_20 : f32 to vector<8x256xf32>
      %84 = arith.select %82, %69, %83 : vector<8x256xi1>, vector<8x256xf32>
      %c0_21 = arith.constant 0 : index
      %c0_22 = arith.constant 0 : index
      %85 = vector.load %arg5[%c0_21, %c0_22] : memref<8x1xf32, #tpu.memory_space<vmem>>, vector<8x1xf32>
      %cst_23 = arith.constant dense<0xFF800000> : vector<8xf32>
      %86 = vector.multi_reduction <maximumf>, %84, %cst_23 [1] : vector<8x256xf32> to vector<8xf32>
      %87 = vector.shape_cast %86 : vector<8xf32> to vector<8x1xf32>
      %88 = arith.maximumf %85, %87 : vector<8x1xf32>
      %c0_24 = arith.constant 0 : index
      %c0_25 = arith.constant 0 : index
      %89 = vector.load %arg5[%c0_24, %c0_25] : memref<8x1xf32, #tpu.memory_space<vmem>>, vector<8x1xf32>
      tpu.vector_store %arg5[%c0_24, %c0_25], %88 {strides = array<i32>} : memref<8x1xf32, #tpu.memory_space<vmem>>, vector<8x1xf32>,
    } else {
    }
    %c1_i32 = arith.constant 1 : i32
    %75 = arith.cmpi eq, %arg0, %c1_i32 : i32
    %76 = arith.extui %75 : i1 to i32
    %c0_i32_17 = arith.constant 0 : i32
    %77 = arith.cmpi ne, %76, %c0_i32_17 : i32
    scf.if %77 {
      %c0_i32_18 = arith.constant 0 : i32
      %78 = arith.cmpi eq, %arg1, %c0_i32_18 : i32
      %79 = arith.extui %78 : i1 to i32
      %c0_i32_19 = arith.constant 0 : i32
      %80 = arith.cmpi ne, %79, %c0_i32_19 : i32
      scf.if %80 {
        %cst_42 = arith.constant 0.000000e+00 : f32
        %119 = vector.broadcast %cst_42 : f32 to vector<1x1xf32>
        %c0_43 = arith.constant 0 : index
        %c0_44 = arith.constant 0 : index
        %120 = vector.load %arg6[%c0_43, %c0_44] : memref<1x1xf32, #tpu.memory_space<vmem>>, vector<1x1xf32>
        tpu.vector_store %arg6[%c0_43, %c0_44], %119 {strides = array<i32>} : memref<1x1xf32, #tpu.memory_space<vmem>>, vector<1x1xf32>,
      } else {
      }
      %c0_20 = arith.constant 0 : index
      %c0_21 = arith.constant 0 : index
      %81 = vector.load %arg5[%c0_20, %c0_21] : memref<8x1xf32, #tpu.memory_space<vmem>>, vector<8x1xf32>
      %cst_22 = arith.constant 0.000000e+00 : f32
      %82 = vector.broadcast %cst_22 : f32 to vector<8x1xf32>
      %83 = arith.cmpf oeq, %81, %82 : vector<8x1xf32>
      %cst_23 = arith.constant 9.99999974E-6 : f32
      %84 = vector.broadcast %cst_23 : f32 to vector<8x1xf32>
      %85 = arith.select %83, %84, %81 : vector<8x1xi1>, vector<8x1xf32>
      %86 = vector.broadcast %85 : vector<8x1xf32> to vector<8x256xf32>
      %87 = arith.cmpf oeq, %69, %86 : vector<8x256xf32>
      %cst_24 = arith.constant 1.000000e+00 : f32
      %cst_25 = arith.constant 0.000000e+00 : f32
      %88 = vector.broadcast %cst_24 : f32 to vector<8x256xf32>
      %89 = vector.broadcast %cst_25 : f32 to vector<8x256xf32>
      %90 = arith.select %87, %88, %89 : vector<8x256xi1>, vector<8x256xf32>
      %cst_26 = arith.constant dense<0xFF800000> : vector<256xf32>
      %91 = vector.multi_reduction <maximumf>, %90, %cst_26 [0] : vector<8x256xf32> to vector<256xf32>
      %92 = vector.shape_cast %91 : vector<256xf32> to vector<1x256xf32>
      %cst_27 = arith.constant 0.000000e+00 : f32
      %93 = vector.broadcast %cst_27 : f32 to vector<1x256xf32>
      %94 = arith.cmpf ogt, %92, %93 : vector<1x256xf32>
      %cst_28 = arith.constant -1.000000e+00 : f32
      %95 = vector.broadcast %cst_28 : f32 to vector<1x256xf32>
      %96 = arith.andi %26, %94 : vector<1x256xi1>
      %cst_29 = arith.constant 1.000000e+00 : f32
      %97 = vector.broadcast %cst_29 : f32 to vector<1x256xf32>
      %98 = arith.select %96, %97, %95 : vector<1x256xi1>, vector<1x256xf32>
      %cst_30 = arith.constant 0.699999988 : f32
      %99 = vector.broadcast %cst_30 : f32 to vector<1x256xf32>
      %100 = arith.cmpf oge, %71, %99 : vector<1x256xf32>
      %101 = arith.andi %26, %100 : vector<1x256xi1>
      %cst_31 = arith.constant 1.000000e+00 : f32
      %102 = vector.broadcast %cst_31 : f32 to vector<1x256xf32>
      %103 = arith.select %101, %102, %98 : vector<1x256xi1>, vector<1x256xf32>
      %cst_32 = arith.constant 3.000000e-01 : f32
      %104 = vector.broadcast %cst_32 : f32 to vector<1x256xf32>
      %105 = arith.cmpf olt, %71, %104 : vector<1x256xf32>
      %106 = arith.andi %26, %105 : vector<1x256xi1>
      %cst_33 = arith.constant 0.000000e+00 : f32
      %107 = vector.broadcast %cst_33 : f32 to vector<1x256xf32>
      %108 = arith.select %106, %107, %103 : vector<1x256xi1>, vector<1x256xf32>
      %cst_34 = arith.constant 1.000000e+00 : f32
      %109 = vector.broadcast %cst_34 : f32 to vector<1x256xf32>
      %110 = arith.cmpf oeq, %108, %109 : vector<1x256xf32>
      %cst_35 = arith.constant 1.000000e+00 : f32
      %cst_36 = arith.constant 0.000000e+00 : f32
      %111 = vector.broadcast %cst_35 : f32 to vector<1x256xf32>
      %112 = vector.broadcast %cst_36 : f32 to vector<1x256xf32>
      %113 = arith.select %110, %111, %112 : vector<1x256xi1>, vector<1x256xf32>
      %c0_37 = arith.constant 0 : index
      %c0_38 = arith.constant 0 : index
      %114 = vector.load %arg6[%c0_37, %c0_38] : memref<1x1xf32, #tpu.memory_space<vmem>>, vector<1x1xf32>
      %cst_39 = arith.constant dense<0.000000e+00> : vector<1xf32>
      %115 = vector.multi_reduction <add>, %113, %cst_39 [1] : vector<1x256xf32> to vector<1xf32>
      %116 = vector.shape_cast %115 : vector<1xf32> to vector<1x1xf32>
      %117 = arith.addf %114, %116 : vector<1x1xf32>
      %c0_40 = arith.constant 0 : index
      %c0_41 = arith.constant 0 : index
      %118 = vector.load %arg6[%c0_40, %c0_41] : memref<1x1xf32, #tpu.memory_space<vmem>>, vector<1x1xf32>
      tpu.vector_store %arg6[%c0_40, %c0_41], %117 {strides = array<i32>} : memref<1x1xf32, #tpu.memory_space<vmem>>, vector<1x1xf32>,
    } else {
    }
    return
  }
  func.func @transform_0(%arg0: i32, %arg1: i32, %arg2: memref<2xi32, #tpu.memory_space<smem>>) -> (i32, i32) {
    %c0_i32 = arith.constant 0 : i32
    %c0_i32_0 = arith.constant 0 : i32
    return %c0_i32, %arg1 : i32, i32
  }
  func.func @transform_1(%arg0: i32, %arg1: i32, %arg2: memref<2xi32, #tpu.memory_space<smem>>) -> (i32, i32) {
    %c0_i32 = arith.constant 0 : i32
    %c0_i32_0 = arith.constant 0 : i32
    %c0_i32_1 = arith.constant 0 : i32
    return %c0_i32, %c0_i32_0 : i32, i32
  }
  func.func @transform_2(%arg0: i32, %arg1: i32, %arg2: memref<2xi32, #tpu.memory_space<smem>>) -> (i32, i32) {
    %c0_i32 = arith.constant 0 : i32
    %c0_i32_0 = arith.constant 0 : i32
    %c0_i32_1 = arith.constant 0 : i32
    return %c0_i32, %c0_i32_0 : i32, i32
  }
  func.func @transform_3(%arg0: i32, %arg1: i32, %arg2: memref<2xi32, #tpu.memory_space<smem>>) -> (i32, i32) {
    %c0_i32 = arith.constant 0 : i32
    %c0_i32_0 = arith.constant 0 : i32
    %c0_i32_1 = arith.constant 0 : i32
    return %c0_i32, %c0_i32_0 : i32, i32
  }
}

</mosaic_0001>

<bundles_post_ra>
// kernel: tpu_custom_call.1
= control target key start
LH: loop header
LB: loop body
LE: loop exit
PB: predicated region body
PF: predicated region fallthrough
CT: control target
= control target key end

     0   :  { %s1097_s0 = inlined_call_operand.vmem [shape: s32[2], index: 0, kind: input, shape index: {}]   ;;  %s1098_s1 = inlined_call_operand.hbm [shape: f32[4,768], index: 1, kind: input, shape index: {}]   ;;  %s1099_s2 = inlined_call_operand.vmem [shape: f32[8,4], index: 2, kind: input, shape index: {}]   ;;  %s1100_s3 = inlined_call_operand.vmem [shape: f32[8,1], index: 3, kind: output, shape index: {0}]   ;;  %s1101_s4 = inlined_call_operand.hbm [shape: f32[1,1], index: 4, kind: output, shape index: {1}]  }
   0x1   :  { %s10_s17 = sshll.u32 %s1097_s0, 4  ;;  %s11_s17 = int_to_ptr.vmem [resolvable:$true] %s10_s17 }
   0x2   :  { %s714_s18 = scalar_lea.vmem %s11_s17, 16  ;;  %p719_p1 = scmp.lt.s32.totalorder %s11_s17, %s11_s17 }
   0x3   :  { %p715_p0 = scmp.ne.s32.totalorder %s11_s17, %s714_s18  ;;  %p720_p2 = scmp.lt.s32.totalorder %s714_s18, %s714_s18 }
   0x5   :  { %p721_p3 = por %p720_p2, %p719_p1 }
   0x7   :  { %p722_p4 = pnand %p721_p3, %p715_p0 }
   0x9   :  { %725 = shalt.err (!%p722_p4)  }
   0xa   :  { %s852_s19 = smov [#allocation3]  }
   0xb   :  { %13 = dma.vmem_to_smem %s11_s17, 16, %s852_s19, [#allocation2] }
   0xc   :  { %810 = dma.done.wait [#allocation2], 16 }
   0xd   :  { %811 = vsyncadd [#allocation2], 4294967280 }
   0xe   :  { %15 = sfence }
   0xf   :  { %16 = vsyncpa [#allocation5], 0 }
  0x10   :  { %18 = vsyncpa [#allocation5 + $0x1], 0 }
  0x11   :  { %19 = vsyncpa [#allocation6], 0  ;;  %s895_s20 = smov 0   ;;  %s897_s21 = smov 0  }
  0x12   :  { %s899_s0 = smov 0   ;;  %s901_s22 = smov 0  }
  0x13   :  { %s903_s23 = smov 0   ;;  %s905_s24 = smov 0  }
  0x14   :  { %s907_s25 = smov 0   ;;  %s909_s26 = smov 0  }
  0x15 LB: > { %s590_s27 = sadd.s32 4294967295, %s850_s26   ;;  %s34_s28 = sadd.s32 1, %s842_s24  ;;  %s850_s26 = sphi %s909_s26, %s25_s26   ;;  %s846_s25 = sphi %s907_s25, %s1114_s25   ;;  %s842_s24 = sphi %s905_s24, %s1113_s24   ;;  %s838_s23 = sphi %s903_s23, %s1112_s23   ;;  %s834_s22 = sphi %s901_s22, %s1111_s22   ;;  %s830_s0 = sphi %s899_s0, %s1110_s0   ;;  %s826_s21 = sphi %s897_s21, %s1109_s21   ;;  %s822_s20 = sphi %s895_s20, %s1108_s20  }
  0x16   : > { %p35_p5 = scmp.ge.s32.totalorder %s34_s28, 3  ;;  %s37_s29 = sadd.s32 1, %s846_s25 }
  0x17   : > { %s44_s30 = sadd.s32 1, %s830_s0  ;;  %p51_p6 = scmp.ne.s32.totalorder %s830_s0, %s826_s21 }
  0x18   : > { %s1116_s28 = smov (%p35_p5, %s34_s28), 0  ;;  %s1118_s29 = smov (!%p35_p5, %s37_s29), %s846_s25 }
  0x19   : > { %s41_s5 = ssub.s32 %s842_s24, %s1116_s28  ;;  %p52_p7 = scmp.eq.s32.totalorder %s850_s26, 0 }
  0x1a   : > { %p39_p8 = scmp.ge.s32.totalorder %s1118_s29, 2  ;;  %p42_p9 = scmp.eq.s32.totalorder %s41_s5, 0 }
  0x1b   : > { %p945_p10 = por %p52_p7, %p51_p6  ;;  %p57_p11 = scmp.ne.s32.totalorder %s826_s21, %s822_s20 }
  0x1c   : > { %s1120_s29 = smov (%p39_p8, %s1118_s29), 0  ;;  %p58_p12 = scmp.eq.s32.totalorder %s590_s27, 0 }
  0x1d   : > { %s953_s7 = scalar_select %p42_p9, %s830_s0, %s44_s30  }
  0x1e   : > { %p622_p13 = scmp.lt.s32.totalorder %s850_s26, 6  ;;  %s147_s8 = sand.u32 1, %s830_s0  }
  0x1f   : > { %p959_p0 = por %p58_p12, %p57_p11  ;;  %s593_s10 = sshll.u32 %s147_s8, 3 }
  0x20   : > { %s611_s11 = sshll.u32 %s842_s24, 7  ;;  %s151_s15 = scalar_lea.vmem [#allocation4], %s593_s10 }
  0x21   : > { %s157_s14 = scalar_lea.hbm %s1098_s1, %s611_s11  ;;  %s159_s16 = sshll.u32 %s151_s15, 4  ;;  %s160_s16 = int_to_ptr.vmem [resolvable:$true] %s159_s16 }
  0x22   : > { %p969_p1 = pnand %p622_p13, %p945_p10  ;;  %p596_p2 = scmp.ge.s32.totalorder %s850_s26, 1 }
  0x23   : > { %p164_p3 = scmp.lt.s32.totalorder %s850_s26, 7  ;;  %s148_s18 = scalar_lea.sflag [#allocation5], %s147_s8 }
  0x24   : > { %p728_p4 = pneg %p969_p1  ;;  %s739_s19 = scalar_lea.vmem %s160_s16, 128 }
  0x25   : > { %p740_p5 = scmp.ne.s32.totalorder %s160_s16, %s739_s19  ;;  %s853_s20 = smov [#allocation4]  }
  0x26   : > { %s744_s30 = sshll.u32 %s853_s20, 4  ;;  %s745_s30 = int_to_ptr.vmem [resolvable:$false] %s744_s30 }
  0x27   : > { %p742_p6 = pnand %p740_p5, %p728_p4  ;;  %s746_s5 = scalar_lea.vmem %s745_s30, 256 }
  0x28   : > { %p747_p8 = scmp.lt.s32.totalorder %s160_s16, %s745_s30  ;;  %p748_p9 = scmp.lt.s32.totalorder %s746_s5, %s739_s19 }
  0x29   : > { %p743_p7 = pneg %p742_p6 }
  0x2a   : > { %p749_p10 = por %p748_p9, %p747_p8 }
  0x2c   : > { %p750_p11 = pnand %p749_p10, %p743_p7 }
  0x2e   : > { %753 = shalt.err (!%p750_p11)
}
  0x2f   : > { %621 = dma.hbm_to_vmem [thread:$0]  (!%p969_p1), %s157_s14, 128, %s160_s16, %s148_s18  }
  0x30   : > { %p165_p12 = pnand %p596_p2, %p164_p3 }
  0x31   : > { %s170_s6 = sand.u32 (!%p165_p12), 1, %s826_s21  }
  0x32   : > { %168 = sbr.rel (%p165_p12) target bundleno = 935 (0x3a7), region = 28  ;;  %s597_s8 = sshll.u32 (!%p165_p12), %s170_s6, 3 }
  0x33   : > { %s171_s10 = scalar_lea.sflag (!%p165_p12), [#allocation5], %s170_s6  ;;  %s174_s11 = scalar_lea.vmem (!%p165_p12), [#allocation4], %s597_s8 }
  0x37   : > { %813 = dma.done.wait (%p959_p0), %s171_s10, 128  }
  0x38   : > { %815 = vsyncadd (%p959_p0), %s171_s10, 4294967168  ;;  %s195_s12 = sld [smem:[#allocation3]]  ;;  %v854_v0 = vmov 2   ;;  %v855_v1 = vmov 3   ;;  %v988_v2 = vld [vmem:[%s174_s11] sm:$0xff]  ;;  %s856_s18 = smov 2   ;;  %v242_v20 = vlaneseq }
  0x39   : > { %703 = vset.pattern.permute.xlu1 %v854_v0  ;;  %705 = vset.pattern.permute.xlu0 %v855_v1  ;;  %s598_s13 = sld [smem:[#allocation3 + $0x1]]  ;;  %v194_v3 = vld [vmem:[%s1099_s2] sm:$0xff]  ;;  %vm199_vm0 = vcmp.ge.f32.partialorder %v988_v2, -0.0  ;;  %v857_v5 = vmov 0   ;;  %v858_v14 = vmov 1   ;;  %s859_s9 = smov 127  }
  0x3a   : > { %232 = vrot.lane.b32.xlu0 %v194_v3, %s856_s18  ;;  %261 = vperm.xlu1 %703, %v194_v3   ;;  %v200_v6 = vsel %vm199_vm0, 1, %v857_v5  ;;  %v243_v21 = vshrl.u32 %v242_v20, 7  ;;  %v222_v31 = vrot.slane %v988_v2, 6  ;;  %p603_p13 = scmp.ne.s32.totalorder %s838_s23, 0 }
  0x3b   : > { %v599_v8 = vrot.slane %v200_v6, 9  ;;  %p604_p0 = scmp.ne.s32.totalorder (!%p603_p13), %s834_s22, 0 }
  0x3c   : > { %v244_v23 = vsub.s32 2, %v243_v21  ;;  %v248_v24 = vsub.s32 6, %v243_v21  ;;  %v1000_v25 = vsub.s32 0, %v243_v21  ;;  %v1002_v26 = vsub.s32 4, %v243_v21 }
  0x3d   : > { %vm203_vm3 = vcmp.ne.s32.totalorder %v599_v8, 0  ;;  %v322_v27 = vsub.s32 1, %v243_v21  ;;  %v326_v28 = vsub.s32 5, %v243_v21  ;;  %v298_v29 = vsub.s32 3, %v243_v21 }
  0x3e   : > { %s196_s14 = scvt.s32.f32 %s195_s12  ;;  %704 = vset.pattern.permute.xlu1 %v857_v5  ;;  %vm204_vm4 = vmand %vm199_vm0, %vm203_vm3  ;;  %v302_v30 = vsub.s32 7, %v243_v21  ;;  %v245_v32 = vrot.slane %v988_v2, %v244_v23  ;;  %v249_v34 = vrot.slane %v988_v2, %v248_v24  ;;  %v269_v35 = vrot.slane %v988_v2, %v1000_v25 }
  0x3f   : > { %s198_s17 = scvt.s32.f32 %s598_s13  ;;  %285 = vperm.xlu1 %704, %v194_v3   ;;  %v273_v36 = vrot.slane %v988_v2, %v1002_v26  ;;  %v323_v37 = vrot.slane %v988_v2, %v322_v27  ;;  %v327_v38 = vrot.slane %v988_v2, %v326_v28  ;;  %v299_v39 = vrot.slane %v988_v2, %v298_v29 }
  0x40   : > { %v214_v4 = vstv %s196_s14  ;;  %v303_v40 = vrot.slane %v988_v2, %v302_v30  ;;  %v224_v41 = vsub.f32 %v988_v2, %v222_v31  ;;  %v255_v42 = vrot.slane %v245_v32, %v244_v23 }
  0x41   : > { %v206_v7 = vstv %s198_s17  ;;  %vm215_vm1 = vcmp.lt.f32.partialorder %v988_v2, %v214_v4  ;;  %v259_v43 = vrot.slane %v249_v34, %v244_v23  ;;  %v279_v44 = vrot.slane %v269_v35, %v1000_v25 }
  0x42   : > { %vm207_vm2 = vcmp.lt.f32.partialorder %v988_v2, %v206_v7  ;;  %v216_v9 = vsel %vm215_vm1, 1, %v857_v5  ;;  %v283_v45 = vrot.slane %v273_v36, %v1000_v25  ;;  %v333_v46 = vrot.slane %v323_v37, %v322_v27 }
  0x43   : > { %v208_v10 = vsel %vm207_vm2, 1, %v857_v5  ;;  %v601_v11 = vrot.slane %v216_v9, 11  ;;  %706 = vset.pattern.permute.xlu1 %v858_v14  ;;  %v337_v48 = vrot.slane %v327_v38, %v322_v27  ;;  %v309_v49 = vrot.slane %v299_v39, %v298_v29 }
  0x44   : > { %v600_v12 = vrot.slane %v208_v10, 10  ;;  %339 = vperm.xlu1 %706, %v194_v3   ;;  %v313_v50 = vrot.slane %v303_v40, %v298_v29  ;;  %v225_v51 = vadd.f32 1.0, %v224_v41 }
  0x45   : > { %vm219_vm5 = vcmp.ne.s32.totalorder %v601_v11, 0 }
  0x46   : > { %vm211_vm6 = vcmp.ne.s32.totalorder %v600_v12, 0  ;;  %v602_v61 = vrot.slane %v225_v51, 9 }
  0x47   : > { %vm212_vm7 = vmand %vm204_vm4, %vm211_vm6 }
  0x48   : > { %vm996_vm8 = vmand %vm212_vm7, %vm219_vm5  ;;  %707 = vset.pattern.permute.xlu1 %v854_v0  ;;  %v230_v2 = vmul.f32 %v602_v61, %v225_v51 }
  0x4a   : > { %v356_v7 = vrot.slane %v230_v2, %v244_v23  ;;  %v360_v8 = vrot.slane %v230_v2, %v248_v24 }
  0x4c   : > { %v366_v14 = vrot.slane %v356_v7, %v244_v23 }
  0xac   : > { %v233_v15 = vpop.permute.xlu0 %232 }
  0xad   : > { %v235_v16 = vsub.f32 %v194_v3, %v233_v15  ;;  %v370_v15 = vrot.slane %v360_v8, %v244_v23 }
  0xaf   : > { %v236_v17 = vadd.f32 1.0, %v235_v16 }
  0xb1   : > { %238 = vrot.lane.b32.xlu0 %v236_v17, %s859_s9 }
  0xb5   : > { %315 = vperm.xlu0 %705, %v194_v3   ;;  %v262_v22 = vpop.permute.xlu1 %261 }
  0xb6   : > { %v264_v53 = vmin.f32 %v255_v42, %v262_v22  ;;  %v265_v54 = vmin.f32 %v259_v43, %v262_v22 }
  0xb9   : > { %708 = vset.pattern.permute.xlu0 %v854_v0 }
  0xba   : > { %v286_v33 = vpop.permute.xlu1 %285 }
  0xbb   : > { %v288_v55 = vmax.f32 %v279_v44, %v286_v33  ;;  %v289_v56 = vmax.f32 %v283_v45, %v286_v33 }
  0xbd   : > { %v290_v62 = vsub.f32 %v264_v53, %v288_v55  ;;  %v291_v63 = vsub.f32 %v265_v54, %v289_v56 }
  0xbf   : > { %v340_v47 = vpop.permute.xlu1 %339  ;;  %v292_v3 = vadd.f32 1.0, %v290_v62  ;;  %v293_v4 = vadd.f32 1.0, %v291_v63 }
  0xc0   : > { %v342_v57 = vmax.f32 %v333_v46, %v340_v47  ;;  %v343_v58 = vmax.f32 %v337_v48, %v340_v47 }
  0xc1   : > { %v294_v9 = vmax.f32 %v292_v3, 0.0  ;;  %v295_v10 = vmax.f32 %v293_v4, 0.0 }
 0x123   : > { %v239_v18 = vpop.permute.xlu0 %238 }
 0x124   : > { %v241_v19 = vmul.f32 %v239_v18, %v236_v17 }
 0x126   : > { %373 = vperm.xlu1 %707, %v241_v19  }
 0x130   : > { %v316_v52 = vpop.permute.xlu0 %315 }
 0x131   : > { %v318_v59 = vmin.f32 %v309_v49, %v316_v52  ;;  %v319_v60 = vmin.f32 %v313_v50, %v316_v52 }
 0x133   : > { %v344_v0 = vsub.f32 %v318_v59, %v342_v57  ;;  %v345_v1 = vsub.f32 %v319_v60, %v343_v58 }
 0x135   : > { %v346_v5 = vadd.f32 1.0, %v344_v0  ;;  %v347_v6 = vadd.f32 1.0, %v345_v1 }
 0x137   : > { %v348_v11 = vmax.f32 %v346_v5, 0.0  ;;  %v349_v12 = vmax.f32 %v347_v6, 0.0 }
 0x139   : > { %v350_v17 = vmul.f32 %v348_v11, %v294_v9  ;;  %v351_v18 = vmul.f32 %v349_v12, %v295_v10 }
 0x1a1   : > { %v374_v16 = vpop.permute.xlu1 %373 }
 0x1a2   : > { %v376_v19 = vadd.f32 %v374_v16, %v366_v14  ;;  %v377_v20 = vadd.f32 %v374_v16, %v370_v15 }
 0x1a4   : > { %v378_v21 = vsub.f32 %v376_v19, %v350_v17  ;;  %v379_v22 = vsub.f32 %v377_v20, %v351_v18 }
 0x1a6   : > { %709 = vrcp.f32 %v378_v21 }
 0x1a7   : > { %711 = vrcp.f32 %v379_v22 }
 0x1b3   : > { %v710_v27 = vpop.eup %709 }
 0x1b4   : > { %v712_v28 = vpop.eup %711  ;;  %v382_v29 = vmul.f32 %v710_v27, %v350_v17 }
 0x1b5   : > { %v383_v30 = vmul.f32 %v712_v28, %v351_v18 }
 0x1b6   : > { %v384_v24 = vrot.slane %v382_v29, 4 }
 0x1b7   : > { %v390_v31 = vrot.slane %v383_v30, 4 }
 0x1b8   : > { %v385_v32 = vmax.f32 %v382_v29, %v384_v24 }
 0x1b9   : > { %v391_v33 = vmax.f32 %v383_v30, %v390_v31 }
 0x1ba   : > { %v386_v34 = vrot.slane %v385_v32, 2 }
 0x1bb   : > { %v392_v35 = vrot.slane %v391_v33, 2 }
 0x1bc   : > { %v387_v23 = vmax.f32 %v385_v32, %v386_v34 }
 0x1bd   : > { %v393_v36 = vmax.f32 %v391_v33, %v392_v35  ;;  %399 = sbr.rel (%p603_p13) target bundleno = 608 (0x260), region = 36 }
 0x1be   : > { %v388_v37 = vrot.slane %v387_v23, 1 }
 0x1bf   : > { %v394_v38 = vrot.slane %v393_v36, 1 }
 0x1c0   : > { %v1018_v39 = vmax.f32 %v387_v23, %v388_v37 }
 0x1c1   : > { %v1020_v40 = vmax.f32 %v393_v36, %v394_v38 }
 0x1c2   : > { %403 = sbr.rel (%p604_p0) target bundleno = 457 (0x1c9), region = 40 }
 0x1c7   : > { %vm404_vm9 = vcmask 7168   ;;  %v860_v41 = vmov 0.0  }
 0x1c8   : > { %405 = vst.msk [vmem:[%s1100_s3] sm:$0xff] %vm404_vm9, %v860_v41 }
 0x1c9 PF: > { %v861_v42 = vmov 0   ;;  %vm432_vm12 = vcmask 7168  }
 0x1ca   : > { %v406_v43 = vsel %vm996_vm8, 1, %v861_v42 }
 0x1cb   : > { %v410_v44 = vrot.slane %v406_v43, %v1000_v25  ;;  %v414_v45 = vrot.slane %v406_v43, %v1002_v26 }
 0x1cd   : > { %v418_v46 = vrot.slane %v410_v44, %v1000_v25  ;;  %v422_v47 = vrot.slane %v414_v45, %v1000_v25 }
 0x1cf   : > { %vm423_vm10 = vcmp.eq.s32.totalorder %v418_v46, 1  ;;  %vm424_vm11 = vcmp.eq.s32.totalorder %v422_v47, 1  ;;  %v427_v51 = vld [vmem:[%s1100_s3] sm:$0xff] }
 0x1d0   : > { %v425_v48 = vsel %vm423_vm10, %v382_v29, 0.0  ;;  %v426_v49 = vsel %vm424_vm11, %v383_v30, 0.0 }
 0x1d1   : > { %v428_v50 = vmax.f32 %v425_v48, %v426_v49 }
 0x1d3   : > { %429 = vmax.xlane.f32.xlu0 %v428_v50 }
 0x25c   : > { %v430_v52 = vpop.xlane.xlu0 %429 }
 0x25d   : > { %v431_v53 = vmax.f32 %v427_v51, %v430_v52 }
 0x25f   : > { %433 = vst.msk [vmem:[%s1100_s3] sm:$0xff] %vm432_vm12, %v431_v53 }
 0x260 PF: > { %p605_p1 = scmp.ne.s32.totalorder %s838_s23, 1 }
 0x261   : > { %p606_p2 = scmp.ne.s32.totalorder (!%p605_p1), %s834_s22, 0 }
 0x262   : > { %437 = sbr.rel (%p605_p1) target bundleno = 920 (0x398), region = 44 }
 0x267   : > { %441 = sbr.rel (%p606_p2) target bundleno = 622 (0x26e), region = 48 }
 0x26c   : > { %vm442_vm13 = vcmask 0   ;;  %v862_v54 = vmov 0.0  }
 0x26d   : > { %443 = vst.msk [vmem:[#allocation7] sm:$0x1] %vm442_vm13, %v862_v54 }
 0x26e PF: > { %v444_v55 = vld [vmem:[%s1100_s3] sm:$0xff]  ;;  %v863_v56 = vmov 0   ;;  %v864_v59 = vmov 0.0   ;;  %vm476_vm1 = vcmp.ge.f32.partialorder %v1018_v39, 0.7  ;;  %v865_v20 = vmov -1.0  }
 0x26f   : > { %713 = vset.pattern.permute.xlu0 %v863_v56  ;;  %vm445_vm14 = vcmp.eq.f32.partialorder %v444_v55, 0.0  ;;  %vm477_vm2 = vcmp.ge.f32.partialorder %v1020_v40, 0.7  ;;  %vm484_vm3 = vcmp.lt.f32.partialorder %v1018_v39, 0.3  ;;  %v478_v4 = vsel %vm476_vm1, 1, %v863_v56 }
 0x270   : > { %v446_v57 = vsel %vm445_vm14, 1e-05, %v444_v55  ;;  %vm485_vm4 = vcmp.lt.f32.partialorder %v1020_v40, 0.3  ;;  %v479_v5 = vsel %vm477_vm2, 1, %v863_v56  ;;  %v486_v8 = vsel %vm484_vm3, 1, %v863_v56 }
 0x271   : > { %449 = vperm.xlu0 %713, %v446_v57   ;;  %v487_v9 = vsel %vm485_vm4, 1, %v863_v56  ;;  %v480_v12 = vcombine.low %v478_v4, %v479_v5 }
 0x272   : > { %v488_v14 = vcombine.low %v486_v8, %v487_v9 }
 0x273   : > { %vm481_vm7 = vcmp.ne.s32.totalorder %v480_v12, 0 }
 0x274   : > { %vm489_vm9 = vcmp.ne.s32.totalorder %v488_v14, 0  ;;  %vm482_vm10 = vmand %vm996_vm8, %vm481_vm7  ;;  %v494_v33 = vld [vmem:[#allocation7] sm:$0x1] }
 0x275   : > { %vm490_vm12 = vmand %vm996_vm8, %vm489_vm9 }
 0x2ec   : > { %v450_v58 = vpop.permute.xlu0 %449 }
 0x2ed   : > { %vm452_vm15 = vcmp.eq.f32.partialorder %v382_v29, %v450_v58  ;;  %vm453_vm0 = vcmp.eq.f32.partialorder %v383_v30, %v450_v58 }
 0x2ee   : > { %v454_v60 = vsel %vm452_vm15, 1.0, %v864_v59  ;;  %v455_v61 = vsel %vm453_vm0, 1.0, %v864_v59  ;;  %vm506_vm15 = vcmask 1040384   ;;  %vm513_vm0 = vcmask 0  }
 0x2ef   : > { %v456_v62 = vrot.slane %v454_v60, 4  ;;  %v462_v63 = vrot.slane %v455_v61, 4 }
 0x2f1   : > { %v457_v0 = vmax.f32 %v454_v60, %v456_v62  ;;  %v463_v1 = vmax.f32 %v455_v61, %v462_v63 }
 0x2f3   : > { %v458_v2 = vrot.slane %v457_v0, 2  ;;  %v464_v3 = vrot.slane %v463_v1, 2 }
 0x2f5   : > { %v459_v6 = vmax.f32 %v457_v0, %v458_v2  ;;  %v465_v7 = vmax.f32 %v463_v1, %v464_v3 }
 0x2f7   : > { %v460_v10 = vrot.slane %v459_v6, 1  ;;  %v466_v11 = vrot.slane %v465_v7, 1 }
 0x2f9   : > { %v461_v15 = vmax.f32 %v459_v6, %v460_v10  ;;  %v467_v16 = vmax.f32 %v465_v7, %v466_v11 }
 0x2fb   : > { %vm468_vm5 = vcmp.gt.f32.partialorder %v461_v15, 0.0  ;;  %vm469_vm6 = vcmp.gt.f32.partialorder %v467_v16, 0.0 }
 0x2fc   : > { %v470_v17 = vsel %vm468_vm5, 1, %v863_v56  ;;  %v471_v18 = vsel %vm469_vm6, 1, %v863_v56 }
 0x2fd   : > { %v472_v19 = vcombine.low %v470_v17, %v471_v18 }
 0x2ff   : > { %vm473_vm11 = vcmp.ne.s32.totalorder %v472_v19, 0 }
 0x300   : > { %vm474_vm13 = vmand %vm996_vm8, %vm473_vm11 }
 0x301   : > { %v475_v21 = vsel %vm474_vm13, 1.0, %v865_v20 }
 0x302   : > { %v483_v22 = vsel %vm482_vm10, 1.0, %v475_v21 }
 0x303   : > { %v491_v27 = vsel %vm490_vm12, 0.0, %v483_v22 }
 0x304   : > { %vm492_vm14 = vcmp.eq.f32.partialorder %v491_v27, 1.0 }
 0x305   : > { %v493_v28 = vsel %vm492_vm14, 1.0, %v864_v59 }
 0x306   : > { %v499_v29 = vrot.slane %v493_v28, %v1000_v25  ;;  %v503_v30 = vrot.slane %v493_v28, %v1002_v26 }
 0x308   : > { %v507_v24 = vsel %vm506_vm15, %v499_v29, 0.0  ;;  %v508_v31 = vsel %vm506_vm15, %v503_v30, 0.0 }
 0x309   : > { %v509_v32 = vadd.f32 %v508_v31, %v507_v24 }
 0x30b   : > { %510 = vadd.xlane.f32.xlu0 %v509_v32 }
 0x394   : > { %v511_v34 = vpop.xlane.xlu0 %510 }
 0x395   : > { %v512_v13 = vadd.f32 %v511_v34, %v494_v33 }
 0x397   : > { %514 = vst.msk [vmem:[#allocation7] sm:$0x1] %vm513_vm0, %v512_v13 }
 0x398 PF: > { %p1058_p3 = scmp.eq.s32.totalorder %s590_s27, 5  ;;  %s866_s23 = smov [#allocation7]  }
 0x399   : > { %s525_s12 = sshll.u32 %s866_s23, 4  ;;  %s526_s12 = int_to_ptr.vmem [resolvable:$true] %s525_s12 }
 0x39a   : > { %s754_s13 = scalar_lea.vmem %s526_s12, 16  ;;  %s760_s14 = scalar_lea.vmem %s526_s12, 32 }
 0x39b   : > { %p755_p4 = scmp.ne.s32.totalorder %s526_s12, %s754_s13  ;;  %p761_p7 = scmp.lt.s32.totalorder %s526_s12, %s526_s12 }
 0x39c   : > { %p762_p8 = scmp.lt.s32.totalorder %s760_s14, %s754_s13 }
 0x39d   : > { %p756_p5 = pnand %p755_p4, %p1058_p3 }
 0x39e   : > { %p763_p9 = por %p762_p8, %p761_p7 }
 0x39f   : > { %p757_p6 = pneg %p756_p5 }
 0x3a1   : > { %p764_p10 = pnand %p763_p9, %p757_p6 }
 0x3a3   : > { %767 = shalt.err (!%p764_p10)
}
 0x3a4   : > { %615 = dma.vmem_to_hbm [thread:$0]  (%p1058_p3), %s526_s12, 16, %s1101_s4, [#allocation6]  }
 0x3a5   : > { %817 = dma.done.wait (%p1058_p3), [#allocation6], 16  }
 0x3a6   : > { %819 = vsyncadd (%p1058_p3), [#allocation6], 4294967280 }
 0x3a7 PF: > { %s25_s26 = sadd.s32 1, %s850_s26   ;;  %s1108_s20 = smov %s826_s21 }
 0x3a8   : > { %p22_p11 = scmp.ge.s32.totalorder %s25_s26, 8   ;;  %s1109_s21 = smov %s830_s0 }
 0x3a9   : > { %s1110_s0 = smov %s953_s7  ;;  %s1111_s22 = smov %s842_s24 }
 0x3aa   : > { %s1112_s23 = smov %s846_s25  ;;  %s1113_s24 = smov %s1116_s28 }
 0x3ab   : > { %s1114_s25 = smov %s1120_s29  ;;  %24 = sbr.rel (!%p22_p11) target bundleno = 21 (0x15), region = 89 }
 0x3b0   :  { %541 = vsyncpa [#allocation5], 1 }
 0x3b1   :  { %543 = vsyncpa [#allocation5 + $0x1], 1 }
 0x3b2   :  { %544 = vsyncpa [#allocation6], 1 }
 0x3b3   :  { %546 = vsyncpa [#allocation6 + $0x1], 1 }

</bundles_post_ra>
